<compile_context>
chip_gen: v7x
topology: tpu7x:2x2x1
jax: 0.10.0
libtpu: 0.0.40
codegen_flags: <defaults>
</compile_context>

<pallas_src>
import functools
import math

import jax
import jax.numpy as jnp
from jax.experimental import pallas as pl
from jax.experimental.pallas import tpu as pltpu  # noqa: F401  (TPU backend)


# ------------------------- Pallas kernel -------------------------

def _generator_mlp_kernel(x_ref, *refs, activations):
    """Fused MLP: x -> [dot(Wt) + shift -> act] * n_layers -> out_ref.

    refs = (wt_0, shift_0, wt_1, shift_1, ..., wt_{L-1}, shift_{L-1}, out_ref)
    BatchNorm (running stats) is pre-folded into wt / shift.
    Intermediate activations never leave vregs/VMEM.
    """
    n_layers = len(activations)
    o_ref = refs[2 * n_layers]

    x = x_ref[...]
    for i, act in enumerate(activations):
        wt = refs[2 * i][...]          # (K_i, N_i), BN-scale folded in
        shift = refs[2 * i + 1][...]   # (1, N_i), bias*scale + BN shift
        y = jnp.dot(x, wt, preferred_element_type=jnp.float32) + shift
        if act == "leaky":             # LeakyReLU(negative_slope=0.25)
            x = jnp.maximum(y, 0.25 * y)
        elif act == "tanh":
            x = jnp.tanh(y)
        else:
            x = y
    o_ref[...] = x.astype(o_ref.dtype)


def _full_spec(shape):
    # Whole-array block; everything here is tiny and fits VMEM comfortably.
    return pl.BlockSpec(shape, lambda: (0,) * len(shape))


def _round_up(n, m):
    return ((n + m - 1) // m) * m


def generator_forward_fused(z, params, out_dim, img_shape):
    """z: (B, latent_dim) f32. Runs the entire generator in one pallas_call."""
    B = z.shape[0]
    M = _round_up(B, 8)                        # sublane-dense batch
    activations = tuple(p["activation"] for p in params)
    n_out = params[-1]["wt"].shape[1]          # padded output width (lane-dense)

    zz = z.astype(jnp.float32)
    if M != B:                                  # static; no-op when aligned
        zz = jnp.pad(zz, ((0, M - B), (0, 0)))

    operands = [zz]
    in_specs = [_full_spec(zz.shape)]
    flops = 0
    bytes_accessed = zz.shape[0] * zz.shape[1] * 4 + M * n_out * 4
    for p in params:
        wt, shift = p["wt"], p["shift"]
        operands += [wt, shift]
        in_specs += [_full_spec(wt.shape), _full_spec(shift.shape)]
        flops += 2 * M * wt.shape[0] * wt.shape[1]
        bytes_accessed += (wt.shape[0] * wt.shape[1] + shift.shape[1]) * 4

    cost = pl.CostEstimate(
        flops=flops,
        transcendentals=M * n_out,             # final tanh
        bytes_accessed=bytes_accessed,
    )

    kernel = functools.partial(_generator_mlp_kernel, activations=activations)
    out = pl.pallas_call(
        kernel,
        out_shape=jax.ShapeDtypeStruct((M, n_out), jnp.float32),
        in_specs=in_specs,
        out_specs=_full_spec((M, n_out)),
        cost_estimate=cost,
    )(*operands)

    # Strip batch / feature padding (no-op when already dense), then
    # img = img.view(img.shape[0], *img_shape)  -> NCHW
    return out[:B, :out_dim].reshape(B, *img_shape)


# ------------------------- Parameter construction -------------------------

def _init_linear(key, in_feat, out_feat):
    """Matches torch.nn.Linear default init: U(-1/sqrt(in), 1/sqrt(in))."""
    k_w, k_b = jax.random.split(key)
    bound = 1.0 / math.sqrt(in_feat)
    w = jax.random.uniform(k_w, (out_feat, in_feat), jnp.float32, -bound, bound)
    b = jax.random.uniform(k_b, (out_feat,), jnp.float32, -bound, bound)
    return w, b


def _bn_fold(num_features, eps=0.75):
    """torch.nn.BatchNorm1d(num_features, 0.75) defaults:
       gamma=1, beta=0, running_mean=0, running_var=1, eps=0.75 (positional)."""
    gamma = jnp.ones((num_features,), jnp.float32)
    beta = jnp.zeros((num_features,), jnp.float32)
    running_mean = jnp.zeros((num_features,), jnp.float32)
    running_var = jnp.ones((num_features,), jnp.float32)
    inv_std = 1.0 / jnp.sqrt(running_var + eps)
    scale = gamma * inv_std
    shift = beta - running_mean * scale
    return scale, shift


def build_generator_params(key, latent_dim, generator_input, img_shape):
    """Returns (params, out_dim).

    params[i] = {"wt": (K_pad, N_pad) f32 with BN scale folded in,
                 "shift": (1, N_pad) f32 (bias*scale + BN shift),
                 "activation": "leaky" | "tanh"}
    All transposes / folds / paddings are done once here, not per forward.
    Feature dims are zero-padded to multiples of 128 (lane-dense); padding is
    transparent because padded weights/shift are 0 and leaky(0)=tanh(0)=0.
    """
    dims = [latent_dim] + list(generator_input)
    out_dim = int(img_shape[0] * img_shape[1] * img_shape[2])

    # (in_feat, out_feat, normalize, activation) per layer, mirroring PyTorch.
    layer_specs = [(dims[0], dims[1], False, "leaky")]
    for i in range(len(generator_input) - 1):
        layer_specs.append((dims[i + 1], dims[i + 2], True, "leaky"))
    layer_specs.append((dims[-1], out_dim, False, "tanh"))

    keys = jax.random.split(key, len(layer_specs))
    params = []
    in_pad = latent_dim  # z itself is passed unpadded (whole-array block)
    for (in_f, out_f, normalize, act), k in zip(layer_specs, keys):
        w, b = _init_linear(k, in_f, out_f)                 # (out_f, in_f)
        if normalize:
            scale, bn_shift = _bn_fold(out_f, eps=0.75)
        else:
            scale = jnp.ones((out_f,), jnp.float32)
            bn_shift = jnp.zeros((out_f,), jnp.float32)

        # Fold BN into the linear: y*scale + shift == x @ (W*scale)^T + shift'
        wt = (w * scale[:, None]).T                          # (in_f, out_f)
        shift = b * scale + bn_shift                         # (out_f,)

        out_pad = _round_up(out_f, 128)
        wt = jnp.pad(wt, ((0, in_pad - in_f), (0, out_pad - out_f)))
        shift = jnp.pad(shift, (0, out_pad - out_f)).reshape(1, out_pad)

        params.append(dict(wt=wt.astype(jnp.float32),
                           shift=shift.astype(jnp.float32),
                           activation=act))
        in_pad = out_pad
    return params, out_dim


# ------------------------- Pure-JAX reference -------------------------

def generator_forward_ref(z, params, out_dim, img_shape):
    """Same math with plain jnp ops (for correctness checking)."""
    x = z.astype(jnp.float32)
    for p in params:
        k = x.shape[1]
        y = x @ p["wt"][:k] + p["shift"]
        if p["activation"] == "leaky":
            x = jnp.where(y >= 0, y, 0.25 * y)
        else:
            x = jnp.tanh(y)
    return x[:, :out_dim].reshape(z.shape[0], *img_shape)


# ------------------------- Demo -------------------------

if __name__ == "__main__":
    # Small, self-consistent "opt" configuration.
    latent_dim = 32
    generator_input = [64, 128, 256]
    channels, img_size = 1, 16
    img_shape = (channels, img_size, img_size)
    batch = 8

    key = jax.random.PRNGKey(0)
    k_params, k_z = jax.random.split(key)

    params, out_dim = build_generator_params(k_params, latent_dim,
                                             generator_input, img_shape)
    z = jax.random.normal(k_z, (batch, latent_dim), dtype=jnp.float32)

    forward = jax.jit(
        lambda zz: generator_forward_fused(zz, params, out_dim, img_shape))

    img = forward(z)
    img = jax.block_until_ready(img)

    assert img.shape == (batch, channels, img_size, img_size), img.shape
    assert img.dtype == jnp.float32
    assert bool(jnp.all(jnp.isfinite(img)))
    assert bool(jnp.all(jnp.abs(img) <= 1.0))   # tanh output range

    ref = generator_forward_ref(z, params, out_dim, img_shape)
    assert bool(jnp.allclose(img, ref, atol=1e-5, rtol=1e-5)), (
        float(jnp.max(jnp.abs(img - ref))))

    print("KERNEL_OK")
</pallas_src>

<mosaic_0001>
module attributes {stable_mosaic.version = 11 : i64} {
  func.func @_generator_mlp_kernel(%arg0: memref<8x32xf32, #tpu.memory_space<vmem>>, %arg1: memref<32x128xf32, #tpu.memory_space<vmem>>, %arg2: memref<1x128xf32, #tpu.memory_space<vmem>>, %arg3: memref<128x128xf32, #tpu.memory_space<vmem>>, %arg4: memref<1x128xf32, #tpu.memory_space<vmem>>, %arg5: memref<128x256xf32, #tpu.memory_space<vmem>>, %arg6: memref<1x256xf32, #tpu.memory_space<vmem>>, %arg7: memref<256x256xf32, #tpu.memory_space<vmem>>, %arg8: memref<1x256xf32, #tpu.memory_space<vmem>>, %arg9: memref<8x256xf32, #tpu.memory_space<vmem>>) attributes {dimension_semantics = [], scalar_prefetch = 0 : i64, scratch_operands = 0 : i64, tpu.core_type = #tpu.core_type<tc>} {
    %c0 = arith.constant 0 : index
    %c0_0 = arith.constant 0 : index
    %0 = vector.load %arg0[%c0, %c0_0] : memref<8x32xf32, #tpu.memory_space<vmem>>, vector<8x32xf32>
    %c0_1 = arith.constant 0 : index
    %c0_2 = arith.constant 0 : index
    %1 = vector.load %arg1[%c0_1, %c0_2] : memref<32x128xf32, #tpu.memory_space<vmem>>, vector<32x128xf32>
    %c0_3 = arith.constant 0 : index
    %c0_4 = arith.constant 0 : index
    %2 = vector.load %arg2[%c0_3, %c0_4] : memref<1x128xf32, #tpu.memory_space<vmem>>, vector<1x128xf32>
    %cst = arith.constant dense<0.000000e+00> : vector<8x128xf32>
    %3 = tpu.matmul %0, %1, %cst {dimension_numbers = #tpu.dot_dimension_numbers<[1], [0], [0], [1], [0, 0, 1, 1], [], []>} : vector<8x32xf32>, vector<32x128xf32>, vector<8x128xf32> -> vector<8x128xf32>
    %4 = vector.broadcast %2 : vector<1x128xf32> to vector<8x128xf32>
    %5 = arith.addf %3, %4 : vector<8x128xf32>
    %cst_5 = arith.constant 2.500000e-01 : f32
    %6 = vector.broadcast %cst_5 : f32 to vector<8x128xf32>
    %7 = arith.mulf %6, %5 : vector<8x128xf32>
    %8 = arith.maximumf %5, %7 : vector<8x128xf32>
    %c0_6 = arith.constant 0 : index
    %c0_7 = arith.constant 0 : index
    %9 = vector.load %arg3[%c0_6, %c0_7] : memref<128x128xf32, #tpu.memory_space<vmem>>, vector<128x128xf32>
    %c0_8 = arith.constant 0 : index
    %c0_9 = arith.constant 0 : index
    %10 = vector.load %arg4[%c0_8, %c0_9] : memref<1x128xf32, #tpu.memory_space<vmem>>, vector<1x128xf32>
    %cst_10 = arith.constant dense<0.000000e+00> : vector<8x128xf32>
    %11 = tpu.matmul %8, %9, %cst_10 {dimension_numbers = #tpu.dot_dimension_numbers<[1], [0], [0], [1], [0, 0, 1, 1], [], []>} : vector<8x128xf32>, vector<128x128xf32>, vector<8x128xf32> -> vector<8x128xf32>
    %12 = vector.broadcast %10 : vector<1x128xf32> to vector<8x128xf32>
    %13 = arith.addf %11, %12 : vector<8x128xf32>
    %cst_11 = arith.constant 2.500000e-01 : f32
    %14 = vector.broadcast %cst_11 : f32 to vector<8x128xf32>
    %15 = arith.mulf %14, %13 : vector<8x128xf32>
    %16 = arith.maximumf %13, %15 : vector<8x128xf32>
    %c0_12 = arith.constant 0 : index
    %c0_13 = arith.constant 0 : index
    %17 = vector.load %arg5[%c0_12, %c0_13] : memref<128x256xf32, #tpu.memory_space<vmem>>, vector<128x256xf32>
    %c0_14 = arith.constant 0 : index
    %c0_15 = arith.constant 0 : index
    %18 = vector.load %arg6[%c0_14, %c0_15] : memref<1x256xf32, #tpu.memory_space<vmem>>, vector<1x256xf32>
    %cst_16 = arith.constant dense<0.000000e+00> : vector<8x256xf32>
    %19 = tpu.matmul %16, %17, %cst_16 {dimension_numbers = #tpu.dot_dimension_numbers<[1], [0], [0], [1], [0, 0, 1, 1], [], []>} : vector<8x128xf32>, vector<128x256xf32>, vector<8x256xf32> -> vector<8x256xf32>
    %20 = vector.broadcast %18 : vector<1x256xf32> to vector<8x256xf32>
    %21 = arith.addf %19, %20 : vector<8x256xf32>
    %cst_17 = arith.constant 2.500000e-01 : f32
    %22 = vector.broadcast %cst_17 : f32 to vector<8x256xf32>
    %23 = arith.mulf %22, %21 : vector<8x256xf32>
    %24 = arith.maximumf %21, %23 : vector<8x256xf32>
    %c0_18 = arith.constant 0 : index
    %c0_19 = arith.constant 0 : index
    %25 = vector.load %arg7[%c0_18, %c0_19] : memref<256x256xf32, #tpu.memory_space<vmem>>, vector<256x256xf32>
    %c0_20 = arith.constant 0 : index
    %c0_21 = arith.constant 0 : index
    %26 = vector.load %arg8[%c0_20, %c0_21] : memref<1x256xf32, #tpu.memory_space<vmem>>, vector<1x256xf32>
    %cst_22 = arith.constant dense<0.000000e+00> : vector<8x256xf32>
    %27 = tpu.matmul %24, %25, %cst_22 {dimension_numbers = #tpu.dot_dimension_numbers<[1], [0], [0], [1], [0, 0, 1, 1], [], []>} : vector<8x256xf32>, vector<256x256xf32>, vector<8x256xf32> -> vector<8x256xf32>
    %28 = vector.broadcast %26 : vector<1x256xf32> to vector<8x256xf32>
    %29 = arith.addf %27, %28 : vector<8x256xf32>
    %30 = math.tanh %29 : vector<8x256xf32>
    %c0_23 = arith.constant 0 : index
    %c0_24 = arith.constant 0 : index
    %31 = vector.load %arg9[%c0_23, %c0_24] : memref<8x256xf32, #tpu.memory_space<vmem>>, vector<8x256xf32>
    tpu.vector_store %arg9[%c0_23, %c0_24], %30 {strides = array<i32>} : memref<8x256xf32, #tpu.memory_space<vmem>>, vector<8x256xf32>,
    return
  }
}

</mosaic_0001>

<bundles_post_ra>
// kernel: _lambda_.1
= control target key start
LH: loop header
LB: loop body
LE: loop exit
PB: predicated region body
PF: predicated region fallthrough
CT: control target
= control target key end

     0   :  { %14 = vsyncpa [#allocation3], 0  ;;  %s1051_s0 = inlined_call_operand.hbm [shape: f32[8,32], index: 0, kind: input, shape index: {}]   ;;  %s1052_s1 = inlined_call_operand.hbm [shape: f32[32,128], index: 1, kind: input, shape index: {}]   ;;  %s1053_s2 = inlined_call_operand.vmem [shape: f32[1,128], index: 2, kind: input, shape index: {}]   ;;  %s1054_s3 = inlined_call_operand.hbm [shape: f32[128,128], index: 3, kind: input, shape index: {}]   ;;  %s1055_s4 = inlined_call_operand.vmem [shape: f32[1,128], index: 4, kind: input, shape index: {}]   ;;  %s1056_s5 = inlined_call_operand.hbm [shape: f32[128,256], index: 5, kind: input, shape index: {}]   ;;  %s1057_s6 = inlined_call_operand.vmem [shape: f32[1,256], index: 6, kind: input, shape index: {}]   ;;  %s1058_s7 = inlined_call_operand.hbm [shape: f32[256,256], index: 7, kind: input, shape index: {}]   ;;  %s1059_s8 = inlined_call_operand.vmem [shape: f32[1,256], index: 8, kind: input, shape index: {}]   ;;  %s1060_s9 = inlined_call_operand.vmem [shape: f32[8,256], index: 9, kind: output, shape index: {}]  }
   0x1   :  { %15 = vsyncpa [#allocation5], 0 }
   0x2   :  { %16 = vsyncpa [#allocation8], 0  ;;  %s887_s30 = smov [#allocation4]   ;;  %s771_s13 = scalar_lea.hbm %s1052_s1, 512 }
   0x3   :  { %s32_s10 = sshll.u32 %s887_s30, 4  ;;  %p772_p0 = scmp.ne.s32.totalorder %s1052_s1, %s771_s13  ;;  %s33_s10 = int_to_ptr.vmem [resolvable:$true] %s32_s10 }
   0x4   :  { %p775_p1 = scmp.lt.u32.totalorder %s771_s13, %s1052_s1 }
   0x6   :  { %p777_p2 = pnand %p775_p1, %p772_p0 }
   0x8   :  { %780 = shalt.err (!%p777_p2)
}
   0x9   :  { %s781_s18 = scalar_lea.vmem %s33_s10, 512  ;;  %p786_p4 = scmp.lt.s32.totalorder %s33_s10, %s33_s10 }
   0xa   :  { %p782_p3 = scmp.ne.s32.totalorder %s33_s10, %s781_s18  ;;  %p787_p5 = scmp.lt.s32.totalorder %s781_s18, %s781_s18 }
   0xc   :  { %p788_p6 = por %p787_p5, %p786_p4 }
   0xe   :  { %p789_p7 = pnand %p788_p6, %p782_p3 }
  0x10   :  { %792 = shalt.err (!%p789_p7)
}
  0x11   :  { %s888_s19 = smov 128   ;;  %s889_s20 = smov 8  }
  0x12   :  { %38 = dma.hbm_to_vmem [thread:$0]  %s1052_s1, 512, %s33_s10, [#allocation5], %s888_s19, %s888_s19, %s889_s20  }
  0x13   :  { %s890_s23 = smov [#allocation7]   ;;  %s793_s27 = scalar_lea.hbm %s1056_s5, 4096 }
  0x14   :  { %s60_s24 = sshll.u32 %s890_s23, 4  ;;  %p794_p8 = scmp.ne.s32.totalorder %s1056_s5, %s793_s27  ;;  %s61_s24 = int_to_ptr.vmem [resolvable:$true] %s60_s24 }
  0x15   :  { %p797_p9 = scmp.lt.u32.totalorder %s793_s27, %s1056_s5 }
  0x17   :  { %p799_p10 = pnand %p797_p9, %p794_p8 }
  0x19   :  { %802 = shalt.err (!%p799_p10)
}
  0x1a   :  { %s803_s12 = scalar_lea.vmem %s61_s24, 4096  ;;  %p808_p12 = scmp.lt.s32.totalorder %s61_s24, %s61_s24 }
  0x1b   :  { %p804_p11 = scmp.ne.s32.totalorder %s61_s24, %s803_s12  ;;  %p809_p13 = scmp.lt.s32.totalorder %s803_s12, %s803_s12 }
  0x1d   :  { %p810_p0 = por %p809_p13, %p808_p12 }
  0x1f   :  { %p811_p1 = pnand %p810_p0, %p804_p11 }
  0x21   :  { %814 = shalt.err (!%p811_p1)
}
  0x22   :  { %s891_s1 = smov 256   ;;  %s892_s10 = smov 16  }
  0x23   :  { %66 = dma.hbm_to_vmem [thread:$0]  %s1056_s5, 4096, %s61_s24, [#allocation8], %s891_s1, %s891_s1, %s892_s10  }
  0x24   :  { %s893_s15 = smov [#allocation2]   ;;  %s894_s17 = smov [#allocation6]  }
  0x25   :  { %s23_s16 = sshll.u32 %s893_s15, 4  ;;  %s46_s18 = sshll.u32 %s894_s17, 4  ;;  %s24_s16 = int_to_ptr.vmem [resolvable:$true] %s23_s16  ;;  %s979_s18 = int_to_ptr.vmem [resolvable:$true] %s46_s18 }
  0x26   :  { %s815_s23 = scalar_lea.hbm %s1051_s0, 128 }
  0x27   :  { %p816_p2 = scmp.ne.s32.totalorder %s1051_s0, %s815_s23  ;;  %p819_p3 = scmp.lt.u32.totalorder %s815_s23, %s1051_s0 }
  0x29   :  { %p821_p4 = pnand %p819_p3, %p816_p2 }
  0x2b   :  { %824 = shalt.err (!%p821_p4)
}
  0x2c   :  { %s825_s5 = scalar_lea.vmem %s24_s16, 128  ;;  %p830_p6 = scmp.lt.s32.totalorder %s24_s16, %s24_s16 }
  0x2d   :  { %p826_p5 = scmp.ne.s32.totalorder %s24_s16, %s825_s5  ;;  %p831_p7 = scmp.lt.s32.totalorder %s825_s5, %s825_s5 }
  0x2f   :  { %p832_p8 = por %p831_p7, %p830_p6 }
  0x31   :  { %p833_p9 = pnand %p832_p8, %p826_p5 }
  0x33   :  { %836 = shalt.err (!%p833_p9)
}
  0x34   :  { %26 = dma.hbm_to_vmem [thread:$0]  %s1051_s0, 128, %s24_s16, [#allocation3]  }
  0x35   :  { %s837_s12 = scalar_lea.hbm %s1054_s3, 2048 }
  0x36   :  { %p838_p10 = scmp.ne.s32.totalorder %s1054_s3, %s837_s12  ;;  %p841_p11 = scmp.lt.u32.totalorder %s837_s12, %s1054_s3 }
  0x38   :  { %p843_p12 = pnand %p841_p11, %p838_p10 }
  0x3a   :  { %846 = shalt.err (!%p843_p12)
}
  0x3b   :  { %s847_s21 = scalar_lea.vmem %s979_s18, 2048  ;;  %p852_p0 = scmp.lt.s32.totalorder %s979_s18, %s979_s18 }
  0x3c   :  { %p848_p13 = scmp.ne.s32.totalorder %s979_s18, %s847_s21  ;;  %p853_p1 = scmp.lt.s32.totalorder %s847_s21, %s847_s21 }
  0x3e   :  { %p854_p2 = por %p853_p1, %p852_p0 }
  0x40   :  { %p855_p3 = pnand %p854_p2, %p848_p13 }
  0x42   :  { %858 = shalt.err (!%p855_p3)
}
  0x43   :  { %52 = dma.hbm_to_vmem [thread:$0]  %s1054_s3, 2048, %s979_s18, [#allocation5], %s888_s19, %s888_s19, %s889_s20  }
  0x44   :  { %s895_s22 = smov [#allocation9]   ;;  %s859_s27 = scalar_lea.hbm %s1058_s7, 8192 }
  0x45   :  { %s74_s23 = sshll.u32 %s895_s22, 4  ;;  %p860_p4 = scmp.ne.s32.totalorder %s1058_s7, %s859_s27  ;;  %s75_s23 = int_to_ptr.vmem [resolvable:$true] %s74_s23 }
  0x46   :  { %p863_p5 = scmp.lt.u32.totalorder %s859_s27, %s1058_s7 }
  0x48   :  { %p865_p6 = pnand %p863_p5, %p860_p4 }
  0x4a   :  { %868 = shalt.err (!%p865_p6)
}
  0x4b   :  { %s869_s30 = scalar_lea.vmem %s75_s23, 8192  ;;  %p874_p8 = scmp.lt.s32.totalorder %s75_s23, %s75_s23 }
  0x4c   :  { %p870_p7 = scmp.ne.s32.totalorder %s75_s23, %s869_s30  ;;  %p875_p9 = scmp.lt.s32.totalorder %s869_s30, %s869_s30 }
  0x4e   :  { %p876_p10 = por %p875_p9, %p874_p8 }
  0x50   :  { %p877_p11 = pnand %p876_p10, %p870_p7 }
  0x52   :  { %880 = shalt.err (!%p877_p11)
}
  0x53   :  { %80 = dma.hbm_to_vmem [thread:$0]  %s1058_s7, 8192, %s75_s23, [#allocation8], %s891_s1, %s891_s1, %s892_s10  }
  0x54   :  { %881 = dma.done.wait [#allocation3], 128  }
  0x55   :  { %882 = vsyncadd [#allocation3], 4294967168 }
  0x56   :  { %883 = dma.done.wait [#allocation5], 2560  }
  0x57   :  { %884 = vsyncadd [#allocation5], 4294964736 }
  0x58   :  { %885 = dma.done.wait [#allocation8], 12288  }
  0x59   :  { %886 = vsyncadd [#allocation8], 4294955008  ;;  %v896_v0 = vmov 0.0|0.0   ;;  %vm897_vm0 = vmmov 0   ;;  %v898_v1 = vmov 0.0   ;;  %v99_v2 = vld [vmem:[#allocation4] sm:$0xff] }
  0x5a   :  { %629 = vmatprep.subr.bf16.mxu0 %v896_v0  ;;  %591 = vmatprep.mubr.msk.f32.mxu0 %vm897_vm0, %v898_v1  ;;  %v100_v3 = vld [vmem:[#allocation4 + $0x8] sm:$0xff]  ;;  %v101_v4 = vld [vmem:[#allocation4 + $0x10] sm:$0xff]  ;;  %v102_v6 = vld [vmem:[#allocation4 + $0x18] sm:$0xff]  ;;  %vm110_vm1 = vcmask 261120  }
  0x5b   :  { %v630_v5 = vpack.c.bf16 %v100_v3, %v99_v2  ;;  %v633_v7 = vpack.c.bf16 %v102_v6, %v101_v4  ;;  %v186_v8 = vld [vmem:[#allocation6] sm:$0xff]  ;;  %v187_v9 = vld [vmem:[#allocation6 + $0x8] sm:$0xff]  ;;  %v98_v10 = vld [vmem:[#allocation2] sm:$0xff] }
  0x5c   :  { %v636_v11 = vpack.c.bf16 %v187_v9, %v186_v8  ;;  %v188_v12 = vld [vmem:[#allocation6 + $0x10] sm:$0xff]  ;;  %v189_v13 = vld [vmem:[#allocation6 + $0x18] sm:$0xff]  ;;  %v190_v15 = vld [vmem:[#allocation6 + $0x20] sm:$0xff] }
  0x5d   :  { %631 = vmatpush3.bf16.msra.mxu0 %v630_v5  ;;  %v639_v14 = vpack.c.bf16 %v189_v13, %v188_v12  ;;  %v191_v16 = vld [vmem:[#allocation6 + $0x28] sm:$0xff]  ;;  %v192_v18 = vld [vmem:[#allocation6 + $0x30] sm:$0xff]  ;;  %v193_v19 = vld [vmem:[#allocation6 + $0x38] sm:$0xff] }
  0x5e   :  { %632 = vmatprep.subr.bf16.mxu0 %v896_v0  ;;  %v642_v17 = vpack.c.bf16 %v191_v16, %v190_v15  ;;  %v645_v20 = vpack.c.bf16 %v193_v19, %v192_v18  ;;  %v194_v21 = vld [vmem:[#allocation6 + $0x40] sm:$0xff]  ;;  %v195_v22 = vld [vmem:[#allocation6 + $0x48] sm:$0xff]  ;;  %v196_v24 = vld [vmem:[#allocation6 + $0x50] sm:$0xff] }
  0x5f   :  { %v648_v23 = vpack.c.bf16 %v195_v22, %v194_v21  ;;  %v197_v25 = vld [vmem:[#allocation6 + $0x58] sm:$0xff]  ;;  %v198_v27 = vld [vmem:[#allocation6 + $0x60] sm:$0xff]  ;;  %v199_v28 = vld [vmem:[#allocation6 + $0x68] sm:$0xff] }
  0x60   :  { %v651_v26 = vpack.c.bf16 %v197_v25, %v196_v24  ;;  %v654_v29 = vpack.c.bf16 %v199_v28, %v198_v27  ;;  %v200_v30 = vld [vmem:[#allocation6 + $0x70] sm:$0xff]  ;;  %v201_v31 = vld [vmem:[#allocation6 + $0x78] sm:$0xff]  ;;  %v282_v33 = vld [vmem:[#allocation7 + $0x8] sm:$0xff] }
  0x61   :  { %634 = vmatpush3.bf16.msra.mxu0 %v633_v7  ;;  %v657_v32 = vpack.c.bf16 %v201_v31, %v200_v30  ;;  %v284_v34 = vld [vmem:[#allocation7 + $0x18] sm:$0xff]  ;;  %v281_v40 = vld [vmem:[#allocation7] sm:$0xff]  ;;  %v283_v41 = vld [vmem:[#allocation7 + $0x10] sm:$0xff] }
  0x62   :  { %635 = vmatprep.subr.bf16.mxu0 %v896_v0  ;;  %v659_v35 = vpack.c.bf16 %v284_v34, %v282_v33  ;;  %v558_v36 = vld [vmem:[%s1053_s2] ss:$0 sm:$0xff]  ;;  %v286_v42 = vld [vmem:[#allocation7 + $0x28] sm:$0xff]  ;;  %v661_v45 = vpack.c.bf16 %v283_v41, %v281_v40  ;;  %v285_v48 = vld [vmem:[#allocation7 + $0x20] sm:$0xff] }
  0x63   :  { %v288_v43 = vld [vmem:[#allocation7 + $0x38] sm:$0xff]  ;;  %v287_v49 = vld [vmem:[#allocation7 + $0x30] sm:$0xff]  ;;  %v290_v50 = vld [vmem:[#allocation7 + $0x48] sm:$0xff] }
  0x64   :  { %592 = vmatmul.mubr.msk.f32.vlgmr.msra.gmra.mrb[0].mxu0 %vm110_vm1, %v98_v10  ;;  %v663_v47 = vpack.c.bf16 %v288_v43, %v286_v42  ;;  %v292_v51 = vld [vmem:[#allocation7 + $0x58] sm:$0xff]  ;;  %v665_v52 = vpack.c.bf16 %v287_v49, %v285_v48  ;;  %v289_v54 = vld [vmem:[#allocation7 + $0x40] sm:$0xff]  ;;  %v291_v55 = vld [vmem:[#allocation7 + $0x50] sm:$0xff] }
  0x65   :  { %637 = vmatpush3.bf16.msra.mxu0 %v636_v11  ;;  %626 = vmatprep.mubr.msk.f32.mxu0 %vm897_vm0, %v898_v1  ;;  %v667_v53 = vpack.c.bf16 %v292_v51, %v290_v50  ;;  %v294_v56 = vld [vmem:[#allocation7 + $0x68] sm:$0xff]  ;;  %v296_v57 = vld [vmem:[#allocation7 + $0x78] sm:$0xff]  ;;  %v669_v58 = vpack.c.bf16 %v291_v55, %v289_v54  ;;  %v293_v60 = vld [vmem:[#allocation7 + $0x60] sm:$0xff] }
  0x66   :  { %638 = vmatprep.subr.bf16.mxu0 %v896_v0  ;;  %v671_v59 = vpack.c.bf16 %v296_v57, %v294_v56  ;;  %v295_v61 = vld [vmem:[#allocation7 + $0x70] sm:$0xff]  ;;  %v298_v62 = vld [vmem:[#allocation7 + $0x88] sm:$0xff]  ;;  %v300_v63 = vld [vmem:[#allocation7 + $0x98] sm:$0xff] }
  0x67   :  { %v675_v2 = vpack.c.bf16 %v300_v63, %v298_v62  ;;  %v297_v3 = vld [vmem:[#allocation7 + $0x80] sm:$0xff]  ;;  %v302_v4 = vld [vmem:[#allocation7 + $0xa8] sm:$0xff]  ;;  %v304_v5 = vld [vmem:[#allocation7 + $0xb8] sm:$0xff] }
  0x68   :  { %v679_v7 = vpack.c.bf16 %v304_v5, %v302_v4  ;;  %v301_v8 = vld [vmem:[#allocation7 + $0xa0] sm:$0xff]  ;;  %v303_v9 = vld [vmem:[#allocation7 + $0xb0] sm:$0xff]  ;;  %v306_v10 = vld [vmem:[#allocation7 + $0xc8] sm:$0xff] }
  0x69   :  { %640 = vmatpush3.bf16.msra.mxu0 %v639_v14  ;;  %v308_v11 = vld [vmem:[#allocation7 + $0xd8] sm:$0xff]  ;;  %v681_v12 = vpack.c.bf16 %v303_v9, %v301_v8  ;;  %v305_v14 = vld [vmem:[#allocation7 + $0xc0] sm:$0xff]  ;;  %v307_v15 = vld [vmem:[#allocation7 + $0xd0] sm:$0xff] }
  0x6a   :  { %641 = vmatprep.subr.bf16.mxu0 %v896_v0  ;;  %v683_v13 = vpack.c.bf16 %v308_v11, %v306_v10  ;;  %v685_v16 = vpack.c.bf16 %v307_v15, %v305_v14  ;;  %v312_v18 = vld [vmem:[#allocation7 + $0xf8] sm:$0xff]  ;;  %v311_v21 = vld [vmem:[#allocation7 + $0xf0] sm:$0xff]  ;;  %v400_v25 = vld [vmem:[#allocation9] sm:$0xff] }
  0x6b   :  { %v403_v24 = vld [vmem:[#allocation9 + $0x18] sm:$0xff]  ;;  %v402_v27 = vld [vmem:[#allocation9 + $0x10] sm:$0xff]  ;;  %v405_v28 = vld [vmem:[#allocation9 + $0x28] sm:$0xff] }
  0x6c   :  { %v693_v30 = vpack.c.bf16 %v402_v27, %v400_v25  ;;  %v406_v33 = vld [vmem:[#allocation9 + $0x30] sm:$0xff]  ;;  %v409_v34 = vld [vmem:[#allocation9 + $0x48] sm:$0xff]  ;;  %v415_v41 = vld [vmem:[#allocation9 + $0x78] sm:$0xff] }
  0x6d   :  { %643 = vmatpush3.bf16.msra.mxu0 %v642_v17  ;;  %v310_v17 = vld [vmem:[#allocation7 + $0xe8] sm:$0xff]  ;;  %v416_v50 = vld [vmem:[#allocation9 + $0x80] sm:$0xff]  ;;  %v418_v51 = vld [vmem:[#allocation9 + $0x90] sm:$0xff] }
  0x6e   :  { %644 = vmatprep.subr.bf16.mxu0 %v896_v0  ;;  %v687_v19 = vpack.c.bf16 %v312_v18, %v310_v17  ;;  %v413_v40 = vld [vmem:[#allocation9 + $0x68] sm:$0xff]  ;;  %v709_v54 = vpack.c.bf16 %v418_v51, %v416_v50  ;;  %v420_v56 = vld [vmem:[#allocation9 + $0xa0] sm:$0xff]  ;;  %v422_v57 = vld [vmem:[#allocation9 + $0xb0] sm:$0xff] }
  0x6f   :  { %v703_v43 = vpack.c.bf16 %v415_v41, %v413_v40  ;;  %v424_v62 = vld [vmem:[#allocation9 + $0xc0] sm:$0xff]  ;;  %v426_v63 = vld [vmem:[#allocation9 + $0xd0] sm:$0xff]  ;;  %v441_v18 = vld [vmem:[#allocation9 + $0x148] sm:$0xff] }
  0x70   :  { %v428_v4 = vld [vmem:[#allocation9 + $0xe0] sm:$0xff]  ;;  %v430_v5 = vld [vmem:[#allocation9 + $0xf0] sm:$0xff]  ;;  %v447_v25 = vld [vmem:[#allocation9 + $0x178] sm:$0xff] }
  0x71   :  { %646 = vmatpush3.bf16.msra.mxu0 %v645_v20  ;;  %v309_v20 = vld [vmem:[#allocation7 + $0xe0] sm:$0xff]  ;;  %v721_v8 = vpack.c.bf16 %v430_v5, %v428_v4  ;;  %v434_v11 = vld [vmem:[#allocation9 + $0x110] sm:$0xff]  ;;  %v459_v50 = vld [vmem:[#allocation9 + $0x1d8] sm:$0xff] }
  0x72   :  { %647 = vmatprep.subr.bf16.mxu0 %v896_v0  ;;  %v689_v22 = vpack.c.bf16 %v311_v21, %v309_v20  ;;  %v432_v10 = vld [vmem:[#allocation9 + $0x100] sm:$0xff]  ;;  %v438_v17 = vld [vmem:[#allocation9 + $0x130] sm:$0xff] }
  0x73   :  { %v725_v14 = vpack.c.bf16 %v434_v11, %v432_v10  ;;  %v452_v40 = vld [vmem:[#allocation9 + $0x1a0] sm:$0xff]  ;;  %v454_v41 = vld [vmem:[#allocation9 + $0x1b0] sm:$0xff] }
  0x75   :  { %649 = vmatpush3.bf16.msra.mxu0 %v648_v23  ;;  %v401_v23 = vld [vmem:[#allocation9 + $0x8] sm:$0xff] }
  0x76   :  { %650 = vmatprep.subr.bf16.mxu0 %v896_v0 }
  0x79   :  { %652 = vmatpush3.bf16.msra.mxu0 %v651_v26  ;;  %v691_v26 = vpack.c.bf16 %v403_v24, %v401_v23  ;;  %v442_v23 = vld [vmem:[#allocation9 + $0x150] sm:$0xff]  ;;  %v445_v24 = vld [vmem:[#allocation9 + $0x168] sm:$0xff] }
  0x7a   :  { %653 = vmatprep.subr.bf16.mxu0 %v896_v0  ;;  %v735_v27 = vpack.c.bf16 %v447_v25, %v445_v24 }
  0x7b   :  { %692 = vmatprep.subr.bf16.mxu1 %v691_v26 }
  0x7c   :  { %694 = vmatpush1.bf16.msra.mxu1 %v693_v30  ;;  %v449_v30 = vld [vmem:[#allocation9 + $0x188] sm:$0xff] }
  0x7d   :  { %655 = vmatpush3.bf16.msra.mxu0 %v654_v29  ;;  %v407_v29 = vld [vmem:[#allocation9 + $0x38] sm:$0xff] }
  0x7e   :  { %656 = vmatprep.subr.bf16.mxu0 %v896_v0  ;;  %v673_v0 = vpack.c.bf16 %v295_v61, %v293_v60  ;;  %v695_v31 = vpack.c.bf16 %v407_v29, %v405_v28  ;;  %v713_v60 = vpack.c.bf16 %v422_v57, %v420_v56  ;;  %v444_v28 = vld [vmem:[#allocation9 + $0x160] sm:$0xff]  ;;  %v446_v29 = vld [vmem:[#allocation9 + $0x170] sm:$0xff]  ;;  %v463_v56 = vld [vmem:[#allocation9 + $0x1f8] sm:$0xff] }
  0x80   :  { %696 = vmatprep.subr.bf16.mxu1 %v695_v31  ;;  %v451_v31 = vld [vmem:[#allocation9 + $0x198] sm:$0xff] }
  0x81   :  { %658 = vmatpush3.bf16.msra.mxu0 %v657_v32  ;;  %v404_v32 = vld [vmem:[#allocation9 + $0x20] sm:$0xff] }
  0x82   :  { %660 = vmatprep.subr.bf16.mxu0 %v659_v35  ;;  %v411_v35 = vld [vmem:[#allocation9 + $0x58] sm:$0xff] }
 0x137   :  { %v180_v37 = vpop.f32.mrb[0].mxu0 }
 0x138   :  { %v181_v38 = vadd.f32 %v558_v36, %v180_v37  ;;  %v593_v39 = vpop.f32.mrb[1].mxu0  ;;  %v697_v36 = vpack.c.bf16 %v406_v33, %v404_v32  ;;  %v699_v37 = vpack.c.bf16 %v411_v35, %v409_v34  ;;  %v737_v32 = vpack.c.bf16 %v446_v29, %v444_v28  ;;  %v448_v34 = vld [vmem:[#allocation9 + $0x180] sm:$0xff]  ;;  %v450_v35 = vld [vmem:[#allocation9 + $0x190] sm:$0xff] }
 0x139   :  { %v410_v39 = vld [vmem:[#allocation9 + $0x50] sm:$0xff]  ;;  %v739_v33 = vpack.c.bf16 %v451_v31, %v449_v30 }
 0x13a   :  { %v184_v44 = vmul.f32 0.25, %v181_v38  ;;  %698 = vmatpush1.bf16.msra.mxu1 %v697_v36  ;;  %v453_v36 = vld [vmem:[#allocation9 + $0x1a8] sm:$0xff] }
 0x13b   :  { %700 = vmatprep.subr.bf16.mxu1 %v699_v37  ;;  %v455_v37 = vld [vmem:[#allocation9 + $0x1b8] sm:$0xff] }
 0x13c   :  { %v185_v46 = vmax.f32 %v181_v38, %v184_v44  ;;  %v408_v38 = vld [vmem:[#allocation9 + $0x40] sm:$0xff] }
 0x13d   :  { %v701_v42 = vpack.c.bf16 %v410_v39, %v408_v38  ;;  %v412_v44 = vld [vmem:[#allocation9 + $0x60] sm:$0xff]  ;;  %v741_v38 = vpack.c.bf16 %v450_v35, %v448_v34  ;;  %v743_v39 = vpack.c.bf16 %v455_v37, %v453_v36 }
 0x13e   :  { %627 = vmatmul.mubr.f32.vlgmr.msra.gmra.mrb[2].mxu0 %v185_v46  ;;  %v417_v46 = vld [vmem:[#allocation9 + $0x88] sm:$0xff] }
 0x13f   :  { %662 = vmatpush1.bf16.msra.mxu0 %v661_v45  ;;  %389 = vmatprep.mubr.f32.mxu0 %v898_v1  ;;  %v299_v1 = vld [vmem:[#allocation7 + $0x90] sm:$0xff] }
 0x140   :  { %664 = vmatprep.subr.bf16.mxu0 %v663_v47  ;;  %v677_v6 = vpack.c.bf16 %v299_v1, %v297_v3  ;;  %v414_v45 = vld [vmem:[#allocation9 + $0x70] sm:$0xff]  ;;  %v419_v47 = vld [vmem:[#allocation9 + $0x98] sm:$0xff]  ;;  %702 = vmatpush1.bf16.msra.mxu1 %v701_v42  ;;  %v717_v3 = vpack.c.bf16 %v426_v63, %v424_v62  ;;  %v745_v42 = vpack.c.bf16 %v454_v41, %v452_v40 }
 0x141   :  { %v705_v48 = vpack.c.bf16 %v414_v45, %v412_v44  ;;  %704 = vmatprep.subr.bf16.mxu1 %v703_v43  ;;  %v707_v49 = vpack.c.bf16 %v419_v47, %v417_v46  ;;  %v560_v43 = vld [vmem:[%s1055_s4] ss:$0 sm:$0xff] }
 0x143   :  { %666 = vmatpush1.bf16.msra.mxu0 %v665_v52  ;;  %v421_v52 = vld [vmem:[#allocation9 + $0xa8] sm:$0xff] }
 0x144   :  { %668 = vmatprep.subr.bf16.mxu0 %v667_v53  ;;  %v423_v53 = vld [vmem:[#allocation9 + $0xb8] sm:$0xff]  ;;  %706 = vmatpush1.bf16.msra.mxu1 %v705_v48 }
 0x145   :  { %708 = vmatprep.subr.bf16.mxu1 %v707_v49  ;;  %v711_v55 = vpack.c.bf16 %v423_v53, %v421_v52  ;;  %v457_v49 = vld [vmem:[#allocation9 + $0x1c8] sm:$0xff]  ;;  %v456_v52 = vld [vmem:[#allocation9 + $0x1c0] sm:$0xff]  ;;  %v458_v53 = vld [vmem:[#allocation9 + $0x1d0] sm:$0xff] }
 0x146   :  { %v747_v51 = vpack.c.bf16 %v459_v50, %v457_v49 }
 0x147   :  { %670 = vmatpush1.bf16.msra.mxu0 %v669_v58  ;;  %v425_v58 = vld [vmem:[#allocation9 + $0xc8] sm:$0xff] }
 0x148   :  { %672 = vmatprep.subr.bf16.mxu0 %v671_v59  ;;  %v427_v59 = vld [vmem:[#allocation9 + $0xd8] sm:$0xff]  ;;  %710 = vmatpush1.bf16.msra.mxu1 %v709_v54  ;;  %v749_v54 = vpack.c.bf16 %v458_v53, %v456_v52 }
 0x149   :  { %712 = vmatprep.subr.bf16.mxu1 %v711_v55  ;;  %v715_v61 = vpack.c.bf16 %v427_v59, %v425_v58  ;;  %v461_v55 = vld [vmem:[#allocation9 + $0x1e8] sm:$0xff]  ;;  %v460_v58 = vld [vmem:[#allocation9 + $0x1e0] sm:$0xff]  ;;  %v462_v59 = vld [vmem:[#allocation9 + $0x1f0] sm:$0xff] }
 0x14a   :  { %v751_v57 = vpack.c.bf16 %v463_v56, %v461_v55 }
 0x14b   :  { %674 = vmatpush1.bf16.msra.mxu0 %v673_v0  ;;  %v429_v0 = vld [vmem:[#allocation9 + $0xe8] sm:$0xff] }
 0x14c   :  { %676 = vmatprep.subr.bf16.mxu0 %v675_v2  ;;  %v431_v2 = vld [vmem:[#allocation9 + $0xf8] sm:$0xff]  ;;  %714 = vmatpush1.bf16.msra.mxu1 %v713_v60  ;;  %v753_v60 = vpack.c.bf16 %v462_v59, %v460_v58 }
 0x14d   :  { %716 = vmatprep.subr.bf16.mxu1 %v715_v61  ;;  %v719_v1 = vpack.c.bf16 %v431_v2, %v429_v0  ;;  %v315_v61 = vlaneseq  ;;  %v313_v0 = vld [vmem:[%s1057_s6] sm:$0x3] }
 0x14f   :  { %678 = vmatpush1.bf16.msra.mxu0 %v677_v6  ;;  %v433_v6 = vld [vmem:[#allocation9 + $0x108] sm:$0xff]  ;;  %v316_v62 = vshrl.u32 %v315_v61, 7 }
 0x150   :  { %680 = vmatprep.subr.bf16.mxu0 %v679_v7  ;;  %v435_v7 = vld [vmem:[#allocation9 + $0x118] sm:$0xff]  ;;  %718 = vmatpush1.bf16.msra.mxu1 %v717_v3 }
 0x151   :  { %720 = vmatprep.subr.bf16.mxu1 %v719_v1  ;;  %v723_v9 = vpack.c.bf16 %v435_v7, %v433_v6  ;;  %v317_v63 = vsub.s32 0, %v316_v62  ;;  %v321_v2 = vsub.s32 1, %v316_v62 }
 0x153   :  { %682 = vmatpush1.bf16.msra.mxu0 %v681_v12  ;;  %v437_v12 = vld [vmem:[#allocation9 + $0x128] sm:$0xff]  ;;  %v318_v3 = vrot.slane %v313_v0, %v317_v63  ;;  %v322_v1 = vrot.slane %v313_v0, %v321_v2 }
 0x154   :  { %684 = vmatprep.subr.bf16.mxu0 %v683_v13  ;;  %v439_v13 = vld [vmem:[#allocation9 + $0x138] sm:$0xff]  ;;  %722 = vmatpush1.bf16.msra.mxu1 %v721_v8 }
 0x155   :  { %724 = vmatprep.subr.bf16.mxu1 %v723_v9  ;;  %v727_v15 = vpack.c.bf16 %v439_v13, %v437_v12  ;;  %v464_v12 = vld [vmem:[%s1059_s8] sm:$0x3] }
 0x156   :  { %v469_v13 = vrot.slane %v464_v12, %v317_v63 }
 0x157   :  { %686 = vmatpush1.bf16.msra.mxu0 %v685_v16  ;;  %v436_v16 = vld [vmem:[#allocation9 + $0x120] sm:$0xff] }
 0x158   :  { %688 = vmatprep.subr.bf16.mxu0 %v687_v19  ;;  %v443_v19 = vld [vmem:[#allocation9 + $0x158] sm:$0xff]  ;;  %726 = vmatpush1.bf16.msra.mxu1 %v725_v14  ;;  %v729_v20 = vpack.c.bf16 %v438_v17, %v436_v16  ;;  %v473_v14 = vrot.slane %v464_v12, %v321_v2 }
 0x159   :  { %728 = vmatprep.subr.bf16.mxu1 %v727_v15  ;;  %v731_v21 = vpack.c.bf16 %v443_v19, %v441_v18 }
 0x15b   :  { %690 = vmatpush1.bf16.msra.mxu0 %v689_v22  ;;  %v440_v22 = vld [vmem:[#allocation9 + $0x140] sm:$0xff] }
 0x15c   :  { %730 = vmatpush1.bf16.msra.mxu1 %v729_v20  ;;  %v733_v26 = vpack.c.bf16 %v442_v23, %v440_v22 }
 0x15d   :  { %732 = vmatprep.subr.bf16.mxu1 %v731_v21 }
 0x160   :  { %734 = vmatpush1.bf16.msra.mxu1 %v733_v26 }
 0x161   :  { %736 = vmatprep.subr.bf16.mxu1 %v735_v27 }
 0x164   :  { %738 = vmatpush1.bf16.msra.mxu1 %v737_v32 }
 0x165   :  { %740 = vmatprep.subr.bf16.mxu1 %v739_v33 }
 0x168   :  { %742 = vmatpush1.bf16.msra.mxu1 %v741_v38 }
 0x169   :  { %744 = vmatprep.subr.bf16.mxu1 %v743_v39 }
 0x16c   :  { %746 = vmatpush1.bf16.msra.mxu1 %v745_v42 }
 0x16d   :  { %748 = vmatprep.subr.bf16.mxu1 %v747_v51 }
 0x170   :  { %750 = vmatpush1.bf16.msra.mxu1 %v749_v54 }
 0x171   :  { %752 = vmatprep.subr.bf16.mxu1 %v751_v57 }
 0x174   :  { %754 = vmatpush1.bf16.msra.mxu1 %v753_v60 }
 0x211   :  { %v275_v44 = vpop.f32.mrb[2].mxu0 }
 0x212   :  { %v276_v45 = vadd.f32 %v560_v43, %v275_v44  ;;  %v628_v46 = vpop.f32.mrb[3].mxu0 }
 0x214   :  { %v279_v47 = vmul.f32 0.25, %v276_v45 }
 0x216   :  { %v280_v48 = vmax.f32 %v276_v45, %v279_v47 }
 0x218   :  { %390 = vmatmul.mubr.f32.vlgmr.msra.gmra.mrb[4].mxu0 %v280_v48 }
 0x2eb   :  { %v391_v4 = vpop.f32.mrb[4].mxu0 }
 0x2ec   :  { %v392_v5 = vadd.f32 %v391_v4, %v318_v3  ;;  %v393_v6 = vpop.f32.mrb[5].mxu0 }
 0x2ed   :  { %v394_v7 = vadd.f32 %v393_v6, %v322_v1 }
 0x2ee   :  { %v396_v8 = vmul.f32 0.25, %v392_v5 }
 0x2ef   :  { %v397_v9 = vmul.f32 0.25, %v394_v7 }
 0x2f0   :  { %v398_v11 = vmax.f32 %v392_v5, %v396_v8 }
 0x2f1   :  { %v399_v10 = vmax.f32 %v394_v7, %v397_v9 }
 0x2f3   :  { %540 = vmatprep.mubr.f32.mxu1 %v399_v10 }
 0x2f4   :  { %541 = vmatmul.mubr.f32.vlgmr.msra.gmra.mrb[0].mxu1 %v398_v11 }
 0x3c7   :  { %v542_v15 = vpop.f32.mrb[0].mxu1 }
 0x3c8   :  { %v543_v16 = vadd.f32 %v542_v15, %v469_v13  ;;  %v544_v17 = vpop.f32.mrb[1].mxu1 }
 0x3c9   :  { %v545_v18 = vadd.f32 %v544_v17, %v473_v14 }
 0x3ca   :  { %767 = vtanh.f32 %v543_v16 }
 0x3cb   :  { %769 = vtanh.f32 %v545_v18 }
 0x3d4   :  { %v768_v19 = vpop.eup %767 }
 0x3d5   :  { %v770_v20 = vpop.eup %769  ;;  %549 = vst [vmem:[%s1060_s9] sm:$0xff] %v768_v19 }
 0x3d6   :  { %550 = vst [vmem:[%s1060_s9 + $0x8] sm:$0xff] %v770_v20 }
 0x3d7   :  { %555 = vsyncpa [#allocation3], 1 }
 0x3d8   :  { %556 = vsyncpa [#allocation5], 1 }
 0x3d9   :  { %557 = vsyncpa [#allocation8], 1 }

</bundles_post_ra>
